<compile_context>
chip_gen: v7x
topology: tpu7x:2x2x1
jax: 0.10.0
libtpu: 0.0.40
codegen_flags: <defaults>
</compile_context>

<pallas_src>
import functools

import jax
import jax.numpy as jnp
from jax import lax
from jax.experimental import pallas as pl
from jax.experimental.pallas import tpu as pltpu

jax.config.update("jax_default_matmul_precision", "highest")


def _pick_tile(n, target):
    """Largest divisor of n that is <= target."""
    t = min(n, target)
    while n % t:
        t -= 1
    return t


# ---------------------------------------------------------------------------
# Kernel 1: GroupNorm statistics — per-(sample, channel) sum and sum-of-squares,
#           accumulated over row tiles directly into the resident (N, 1, C) outputs.
# ---------------------------------------------------------------------------
def _gn_stats_kernel(x_ref, s1_ref, s2_ref):
    @pl.when(pl.program_id(1) == 0)
    def _():
        s1_ref[...] = jnp.zeros_like(s1_ref)
        s2_ref[...] = jnp.zeros_like(s2_ref)

    th, wv, c = x_ref.shape
    x = x_ref[...].reshape(th * wv, c)
    s1_ref[...] += jnp.sum(x, axis=0, keepdims=True)
    s2_ref[...] += jnp.sum(x * x, axis=0, keepdims=True)


def gn_stats(x_nhwc, *, tile_h):
    n, h, w, c = x_nhwc.shape
    return pl.pallas_call(
        _gn_stats_kernel,
        out_shape=(jax.ShapeDtypeStruct((n, 1, c), jnp.float32),
                   jax.ShapeDtypeStruct((n, 1, c), jnp.float32)),
        grid=(n, h // tile_h),
        in_specs=[pl.BlockSpec((None, tile_h, w, c), lambda nb, ib: (nb, ib, 0, 0))],
        out_specs=(pl.BlockSpec((None, 1, c), lambda nb, ib: (nb, 0, 0)),
                   pl.BlockSpec((None, 1, c), lambda nb, ib: (nb, 0, 0))),
        compiler_params=pltpu.CompilerParams(
            dimension_semantics=("parallel", "arbitrary")),
    )(x_nhwc)


def _finish_gn(s1, s2, gamma, beta, hw, groups, eps):
    """Tiny (N, C)-sized group combine in XLA: sums -> per-channel scale/shift."""
    n, _, c = s1.shape
    cg = c // groups
    cnt = float(cg * hw)
    s1g = s1.reshape(n, groups, cg).sum(axis=-1, keepdims=True)
    s2g = s2.reshape(n, groups, cg).sum(axis=-1, keepdims=True)
    mean = s1g / cnt
    var = s2g / cnt - mean * mean
    inv = lax.rsqrt(var + eps)
    mean = jnp.broadcast_to(mean, (n, groups, cg)).reshape(n, 1, c)
    inv = jnp.broadcast_to(inv, (n, groups, cg)).reshape(n, 1, c)
    gamma = gamma.reshape(1, 1, c).astype(jnp.float32)
    beta = beta.reshape(1, 1, c).astype(jnp.float32)
    scale = inv * gamma
    shift = beta - mean * scale
    return scale, shift


# ---------------------------------------------------------------------------
# Kernel 2: fused GroupNorm + SiLU + 3x3 conv (tap accumulation) + bias + add.
#           x block is a halo'ed row tile (tile_h+2, W+2, Cin); `add` is either a
#           per-sample (1, Cout) broadcast (time embedding) or a spatial residual.
# ---------------------------------------------------------------------------
def _gn_silu_conv3x3_kernel(x_ref, scale_ref, shift_ref, w_ref, b_ref, add_ref,
                            o_ref, *, tile_h, h_img, w_img):
    th2, wp, cin = x_ref.shape            # (tile_h + 2, W + 2, Cin)
    cout = o_ref.shape[-1]                # Cout tile

    # fused GroupNorm (precomputed per-sample scale/shift) + SiLU, in f32 (VPU/EUP).
    x = x_ref[...]
    y = x * scale_ref[...] + shift_ref[...]
    y = y * jax.nn.sigmoid(y)

    # zero the conv's zero-padding halo (must be zero *after* GN + SiLU).
    row0 = pl.program_id(2) * tile_h
    rows = row0 + lax.broadcasted_iota(jnp.int32, (th2, wp), 0)
    cols = lax.broadcasted_iota(jnp.int32, (th2, wp), 1)
    valid = (rows >= 1) & (rows <= h_img) & (cols >= 1) & (cols <= w_img)
    y = jnp.where(valid[:, :, None], y, 0.0)

    # 3x3 conv = 9 tap-accumulated MXU matmuls (bf16 operands, f32 accumulation).
    acc = jnp.zeros((tile_h * w_img, cout), jnp.float32)
    for dx in range(3):
        ycol = y[:, dx:dx + w_img, :].astype(jnp.bfloat16)       # (th2, W, Cin)
        for dy in range(3):
            tap = ycol[dy:dy + tile_h].reshape(tile_h * w_img, cin)
            acc = acc + jnp.dot(tap, w_ref[dy * 3 + dx],
                                preferred_element_type=jnp.float32)

    out = acc.reshape(tile_h, w_img, cout) + b_ref[...] + add_ref[...]
    o_ref[...] = out.astype(o_ref.dtype)


def gn_silu_conv3x3(x_tiles, scale, shift, w_taps, bias, add, *,
                    h, w, tile_h, tile_co, n_tiles):
    # TODO(synk): for very wide SD layers (Cin/Cout ~ 1280) also tile the Cin
    # reduction and set vmem_limit_bytes per generation (v7x has only 64 MiB VMEM).
    nt_total, th2, wp, cin = x_tiles.shape
    n = nt_total // n_tiles
    cout = w_taps.shape[-1]
    n_co = cout // tile_co

    if add.ndim == 3:   # (N, 1, Cout): per-sample broadcast add (time embedding)
        add_spec = pl.BlockSpec((None, 1, tile_co), lambda nb, jb, ib: (nb, 0, jb))
    else:               # (N, H, W, Cout): full spatial add (residual)
        add_spec = pl.BlockSpec((None, tile_h, w, tile_co),
                                lambda nb, jb, ib: (nb, ib, 0, jb))

    kernel = functools.partial(_gn_silu_conv3x3_kernel,
                               tile_h=tile_h, h_img=h, w_img=w)
    return pl.pallas_call(
        kernel,
        out_shape=jax.ShapeDtypeStruct((n, h, w, cout), jnp.float32),
        grid=(n, n_co, n_tiles),
        in_specs=[
            pl.BlockSpec((None, th2, wp, cin),
                         lambda nb, jb, ib: (nb * n_tiles + ib, 0, 0, 0)),
            pl.BlockSpec((None, 1, cin), lambda nb, jb, ib: (nb, 0, 0)),
            pl.BlockSpec((None, 1, cin), lambda nb, jb, ib: (nb, 0, 0)),
            pl.BlockSpec((9, cin, tile_co), lambda nb, jb, ib: (0, 0, jb)),
            pl.BlockSpec((1, tile_co), lambda nb, jb, ib: (0, jb)),
            add_spec,
        ],
        out_specs=pl.BlockSpec((None, tile_h, w, tile_co),
                               lambda nb, jb, ib: (nb, ib, 0, jb)),
        compiler_params=pltpu.CompilerParams(
            dimension_semantics=("parallel", "parallel", "parallel")),
    )(x_tiles, scale, shift, w_taps, bias, add)


# ---------------------------------------------------------------------------
# Kernel 3: tiled matmul + bias (1x1 residual conv), bf16 MXU, no dummy add.
# ---------------------------------------------------------------------------
def _matmul_bias_kernel(x_ref, w_ref, b_ref, o_ref):
    acc = jnp.dot(x_ref[...].astype(jnp.bfloat16), w_ref[...],
                  preferred_element_type=jnp.float32)
    o_ref[...] = (acc + b_ref[...]).astype(o_ref.dtype)


def matmul_bias(x, w_bf16, b):
    n, hw, cin = x.shape
    cout = w_bf16.shape[-1]
    tile_hw = _pick_tile(hw, 1024)
    return pl.pallas_call(
        _matmul_bias_kernel,
        out_shape=jax.ShapeDtypeStruct((n, hw, cout), jnp.float32),
        grid=(n, hw // tile_hw),
        in_specs=[
            pl.BlockSpec((None, tile_hw, cin), lambda nb, ib: (nb, ib, 0)),
            pl.BlockSpec((cin, cout), lambda nb, ib: (0, 0)),
            pl.BlockSpec((1, cout), lambda nb, ib: (0, 0)),
        ],
        out_specs=pl.BlockSpec((None, tile_hw, cout), lambda nb, ib: (nb, ib, 0)),
        compiler_params=pltpu.CompilerParams(
            dimension_semantics=("parallel", "parallel")),
    )(x, w_bf16, b)


# ---------------------------------------------------------------------------
# Glue: halo'ed row tiling and weight re-layout (thin XLA data movement only).
# ---------------------------------------------------------------------------
def _overlap_row_tiles(x_nhwc, tile_h):
    """Zero-pad H/W by 1 and restructure into overlapping row tiles with a one-row
    halo on each side: (N * H//tile_h, tile_h + 2, W + 2, C)."""
    n, h, w, c = x_nhwc.shape
    xp = jnp.pad(x_nhwc, ((0, 0), (1, 1), (1, 1), (0, 0)))
    n_tiles = h // tile_h
    tiles = [lax.slice_in_dim(xp, i * tile_h, i * tile_h + tile_h + 2, axis=1)
             for i in range(n_tiles)]
    stacked = jnp.stack(tiles, axis=1)          # (N, n_tiles, tile_h+2, W+2, C)
    return stacked.reshape(n * n_tiles, tile_h + 2, w + 2, c)


def _conv3x3_w_to_taps(w_oihw):
    """(Cout, Cin, 3, 3) -> (9, Cin, Cout) bf16, tap index = dy*3 + dx."""
    co, ci, kh, kw = w_oihw.shape
    return jnp.transpose(w_oihw, (2, 3, 1, 0)).reshape(kh * kw, ci, co).astype(jnp.bfloat16)


# ---------------------------------------------------------------------------
# Full forward pass (matches the PyTorch UNet_ResidualBlock.forward)
# ---------------------------------------------------------------------------
def unet_residual_block(feature_nchw, time, params, *, groups=32, eps=1e-5):
    n, cin, h, w = feature_nchw.shape
    cout = params["conv1_w"].shape[0]

    tile_h = _pick_tile(h, 8)        # spatial row tile (halo'ed by one row each side)
    tile_co = _pick_tile(cout, 256)  # output-channel tile of the conv kernels
    n_tiles = h // tile_h

    x = jnp.transpose(feature_nchw, (0, 2, 3, 1)).astype(jnp.float32)   # (N,H,W,Cin)

    # GroupNorm-1 statistics (Pallas reduction) + tiny group combine (XLA).
    s1, s2 = gn_stats(x, tile_h=tile_h)
    scale1, shift1 = _finish_gn(s1, s2, params["gn1_gamma"], params["gn1_beta"],
                                h * w, groups, eps)

    # time path: SiLU + Linear. (N x n_time)@(n_time x Cout) with N ~ 2 is left in
    # XLA per the perf review (MXU M padded 2->8; a Pallas call is launch-dominated).
    t = time.astype(jnp.float32)
    t = t * jax.nn.sigmoid(t)
    t_emb = t @ params["lin_w"].astype(jnp.float32).T + params["lin_b"].astype(jnp.float32)
    t_emb = t_emb.reshape(n, 1, cout)

    # conv_feature: fused GN1 + SiLU + 3x3 conv + bias + time-embedding add.
    merged = gn_silu_conv3x3(
        _overlap_row_tiles(x, tile_h), scale1, shift1,
        _conv3x3_w_to_taps(params["conv1_w"]),
        params["conv1_b"].reshape(1, cout).astype(jnp.float32),
        t_emb, h=h, w=w, tile_h=tile_h, tile_co=tile_co, n_tiles=n_tiles)

    # GroupNorm-2 statistics.
    s1m, s2m = gn_stats(merged, tile_h=tile_h)
    scale2, shift2 = _finish_gn(s1m, s2m, params["gn2_gamma"], params["gn2_beta"],
                                h * w, groups, eps)

    # residual path: identity, or a tiled 1x1-conv matmul (no dummy zero add).
    if cin == cout:
        res = x
    else:
        res = matmul_bias(x.reshape(n, h * w, cin),
                          jnp.transpose(params["res_w"][:, :, 0, 0]).astype(jnp.bfloat16),
                          params["res_b"].reshape(1, cout).astype(jnp.float32))
        res = res.reshape(n, h, w, cout)

    # conv_merged: fused GN2 + SiLU + 3x3 conv + bias + residual add.
    out = gn_silu_conv3x3(
        _overlap_row_tiles(merged, tile_h), scale2, shift2,
        _conv3x3_w_to_taps(params["conv2_w"]),
        params["conv2_b"].reshape(1, cout).astype(jnp.float32),
        res, h=h, w=w, tile_h=tile_h, tile_co=tile_co, n_tiles=n_tiles)

    return jnp.transpose(out, (0, 3, 1, 2))


# ---------------------------------------------------------------------------
# Pure-JAX reference (mirrors PyTorch semantics) for verification
# ---------------------------------------------------------------------------
def _ref_forward(feature, time, params, *, groups=32, eps=1e-5):
    def groupnorm(x, gamma, beta):
        n, c, h, w = x.shape
        xg = x.reshape(n, groups, c // groups, h, w)
        mean = xg.mean(axis=(2, 3, 4), keepdims=True)
        var = xg.var(axis=(2, 3, 4), keepdims=True)
        xn = ((xg - mean) / jnp.sqrt(var + eps)).reshape(n, c, h, w)
        return xn * gamma[None, :, None, None] + beta[None, :, None, None]

    def silu(x):
        return x * jax.nn.sigmoid(x)

    def conv(x, wt, b, pad):
        y = lax.conv_general_dilated(x, wt, (1, 1), [(pad, pad), (pad, pad)],
                                     dimension_numbers=("NCHW", "OIHW", "NCHW"),
                                     precision=lax.Precision.HIGHEST)
        return y + b[None, :, None, None]

    h = conv(silu(groupnorm(feature, params["gn1_gamma"], params["gn1_beta"])),
             params["conv1_w"], params["conv1_b"], 1)
    t = silu(time) @ params["lin_w"].T + params["lin_b"]
    merged = h + t[:, :, None, None]
    merged = conv(silu(groupnorm(merged, params["gn2_gamma"], params["gn2_beta"])),
                  params["conv2_w"], params["conv2_b"], 1)
    if params["conv1_w"].shape[0] == feature.shape[1]:
        res = feature
    else:
        res = conv(feature, params["res_w"], params["res_b"], 0)
    return merged + res


if __name__ == "__main__":
    # small but GroupNorm(32)-compatible shapes
    N, CIN, COUT, H, W, NTIME = 2, 32, 64, 16, 16, 128

    key = jax.random.PRNGKey(0)
    keys = jax.random.split(key, 14)
    feature = jax.random.normal(keys[0], (N, CIN, H, W), jnp.float32)
    time = jax.random.normal(keys[1], (N, NTIME), jnp.float32)

    params = {
        "gn1_gamma": 1.0 + 0.1 * jax.random.normal(keys[2], (CIN,), jnp.float32),
        "gn1_beta": 0.1 * jax.random.normal(keys[3], (CIN,), jnp.float32),
        "conv1_w": 0.05 * jax.random.normal(keys[4], (COUT, CIN, 3, 3), jnp.float32),
        "conv1_b": 0.05 * jax.random.normal(keys[5], (COUT,), jnp.float32),
        "lin_w": 0.05 * jax.random.normal(keys[6], (COUT, NTIME), jnp.float32),
        "lin_b": 0.05 * jax.random.normal(keys[7], (COUT,), jnp.float32),
        "gn2_gamma": 1.0 + 0.1 * jax.random.normal(keys[8], (COUT,), jnp.float32),
        "gn2_beta": 0.1 * jax.random.normal(keys[9], (COUT,), jnp.float32),
        "conv2_w": 0.05 * jax.random.normal(keys[10], (COUT, COUT, 3, 3), jnp.float32),
        "conv2_b": 0.05 * jax.random.normal(keys[11], (COUT,), jnp.float32),
        "res_w": 0.05 * jax.random.normal(keys[12], (COUT, CIN, 1, 1), jnp.float32),
        "res_b": 0.05 * jax.random.normal(keys[13], (COUT,), jnp.float32),
    }

    out = jax.block_until_ready(unet_residual_block(feature, time, params))
    ref = jax.block_until_ready(_ref_forward(feature, time, params))

    assert out.shape == (N, COUT, H, W), out.shape
    assert bool(jnp.all(jnp.isfinite(out)))
    # bf16 MXU operands with f32 accumulation (per perf review) -> slightly looser
    # tolerance than a pure-f32 comparison; observed error is well below this bound.
    max_err = float(jnp.max(jnp.abs(out - ref)))
    assert max_err < 3e-2, f"max abs error vs reference: {max_err}"
    print("KERNEL_OK")
</pallas_src>

<mosaic_0001>
module attributes {stable_mosaic.version = 11 : i64} {
  func.func @_gn_stats_kernel(%arg0: i32, %arg1: i32, %arg2: memref<1x8x16x32xf32, #tpu.memory_space<vmem>>, %arg3: memref<1x1x32xf32, #tpu.memory_space<vmem>>, %arg4: memref<1x1x32xf32, #tpu.memory_space<vmem>>) attributes {dimension_semantics = [#tpu.dimension_semantics<parallel>, #tpu.dimension_semantics<arbitrary>], iteration_bounds = array<i64: 2, 2>, scalar_prefetch = 0 : i64, scratch_operands = 0 : i64, tpu.core_type = #tpu.core_type<tc>, window_params = [{transform_indices = @transform_0, window_bounds = array<i64: 1, 8, 16, 32>}, {transform_indices = @transform_1, window_bounds = array<i64: 1, 1, 32>}, {transform_indices = @transform_2, window_bounds = array<i64: 1, 1, 32>}]} {
    %c0_i32 = arith.constant 0 : i32
    %0 = arith.cmpi eq, %arg1, %c0_i32 : i32
    %1 = arith.extui %0 : i1 to i32
    %c0_i32_0 = arith.constant 0 : i32
    %2 = arith.cmpi ne, %1, %c0_i32_0 : i32
    scf.if %2 {
      %cst_17 = arith.constant 0.000000e+00 : f32
      %23 = vector.broadcast %cst_17 : f32 to vector<1x32xf32>
      %c0_18 = arith.constant 0 : index
      %c0_19 = arith.constant 0 : index
      %c0_20 = arith.constant 0 : index
      %24 = vector.load %arg3[%c0_18, %c0_19, %c0_20] : memref<1x1x32xf32, #tpu.memory_space<vmem>>, vector<1x1x32xf32>
      %25 = vector.shape_cast %24 : vector<1x1x32xf32> to vector<1x32xf32>
      %26 = vector.shape_cast %23 : vector<1x32xf32> to vector<1x1x32xf32>
      tpu.vector_store %arg3[%c0_18, %c0_19, %c0_20], %26 {strides = array<i32>} : memref<1x1x32xf32, #tpu.memory_space<vmem>>, vector<1x1x32xf32>,
      %cst_21 = arith.constant 0.000000e+00 : f32
      %27 = vector.broadcast %cst_21 : f32 to vector<1x32xf32>
      %c0_22 = arith.constant 0 : index
      %c0_23 = arith.constant 0 : index
      %c0_24 = arith.constant 0 : index
      %28 = vector.load %arg4[%c0_22, %c0_23, %c0_24] : memref<1x1x32xf32, #tpu.memory_space<vmem>>, vector<1x1x32xf32>
      %29 = vector.shape_cast %28 : vector<1x1x32xf32> to vector<1x32xf32>
      %30 = vector.shape_cast %27 : vector<1x32xf32> to vector<1x1x32xf32>
      tpu.vector_store %arg4[%c0_22, %c0_23, %c0_24], %30 {strides = array<i32>} : memref<1x1x32xf32, #tpu.memory_space<vmem>>, vector<1x1x32xf32>,
    } else {
    }
    %c0 = arith.constant 0 : index
    %c0_1 = arith.constant 0 : index
    %c0_2 = arith.constant 0 : index
    %c0_3 = arith.constant 0 : index
    %3 = vector.load %arg2[%c0, %c0_1, %c0_2, %c0_3] : memref<1x8x16x32xf32, #tpu.memory_space<vmem>>, vector<1x8x16x32xf32>
    %4 = vector.shape_cast %3 : vector<1x8x16x32xf32> to vector<8x16x32xf32>
    %5 = vector.shape_cast %4 : vector<8x16x32xf32> to vector<128x32xf32>
    %c0_4 = arith.constant 0 : index
    %c0_5 = arith.constant 0 : index
    %c0_6 = arith.constant 0 : index
    %6 = vector.load %arg3[%c0_4, %c0_5, %c0_6] : memref<1x1x32xf32, #tpu.memory_space<vmem>>, vector<1x1x32xf32>
    %7 = vector.shape_cast %6 : vector<1x1x32xf32> to vector<1x32xf32>
    %cst = arith.constant dense<0.000000e+00> : vector<32xf32>
    %8 = vector.multi_reduction <add>, %5, %cst [0] : vector<128x32xf32> to vector<32xf32>
    %9 = vector.shape_cast %8 : vector<32xf32> to vector<1x32xf32>
    %10 = arith.addf %7, %9 : vector<1x32xf32>
    %c0_7 = arith.constant 0 : index
    %c0_8 = arith.constant 0 : index
    %c0_9 = arith.constant 0 : index
    %11 = vector.load %arg3[%c0_7, %c0_8, %c0_9] : memref<1x1x32xf32, #tpu.memory_space<vmem>>, vector<1x1x32xf32>
    %12 = vector.shape_cast %11 : vector<1x1x32xf32> to vector<1x32xf32>
    %13 = vector.shape_cast %10 : vector<1x32xf32> to vector<1x1x32xf32>
    tpu.vector_store %arg3[%c0_7, %c0_8, %c0_9], %13 {strides = array<i32>} : memref<1x1x32xf32, #tpu.memory_space<vmem>>, vector<1x1x32xf32>,
    %c0_10 = arith.constant 0 : index
    %c0_11 = arith.constant 0 : index
    %c0_12 = arith.constant 0 : index
    %14 = vector.load %arg4[%c0_10, %c0_11, %c0_12] : memref<1x1x32xf32, #tpu.memory_space<vmem>>, vector<1x1x32xf32>
    %15 = vector.shape_cast %14 : vector<1x1x32xf32> to vector<1x32xf32>
    %16 = arith.mulf %5, %5 : vector<128x32xf32>
    %cst_13 = arith.constant dense<0.000000e+00> : vector<32xf32>
    %17 = vector.multi_reduction <add>, %16, %cst_13 [0] : vector<128x32xf32> to vector<32xf32>
    %18 = vector.shape_cast %17 : vector<32xf32> to vector<1x32xf32>
    %19 = arith.addf %15, %18 : vector<1x32xf32>
    %c0_14 = arith.constant 0 : index
    %c0_15 = arith.constant 0 : index
    %c0_16 = arith.constant 0 : index
    %20 = vector.load %arg4[%c0_14, %c0_15, %c0_16] : memref<1x1x32xf32, #tpu.memory_space<vmem>>, vector<1x1x32xf32>
    %21 = vector.shape_cast %20 : vector<1x1x32xf32> to vector<1x32xf32>
    %22 = vector.shape_cast %19 : vector<1x32xf32> to vector<1x1x32xf32>
    tpu.vector_store %arg4[%c0_14, %c0_15, %c0_16], %22 {strides = array<i32>} : memref<1x1x32xf32, #tpu.memory_space<vmem>>, vector<1x1x32xf32>,
    return
  }
  func.func @transform_0(%arg0: i32, %arg1: i32) -> (i32, i32, i32, i32) {
    %c0_i32 = arith.constant 0 : i32
    %c0_i32_0 = arith.constant 0 : i32
    %c0_i32_1 = arith.constant 0 : i32
    return %arg0, %arg1, %c0_i32, %c0_i32_0 : i32, i32, i32, i32
  }
  func.func @transform_1(%arg0: i32, %arg1: i32) -> (i32, i32, i32) {
    %c0_i32 = arith.constant 0 : i32
    %c0_i32_0 = arith.constant 0 : i32
    %c0_i32_1 = arith.constant 0 : i32
    return %arg0, %c0_i32, %c0_i32_0 : i32, i32, i32
  }
  func.func @transform_2(%arg0: i32, %arg1: i32) -> (i32, i32, i32) {
    %c0_i32 = arith.constant 0 : i32
    %c0_i32_0 = arith.constant 0 : i32
    %c0_i32_1 = arith.constant 0 : i32
    return %arg0, %c0_i32, %c0_i32_0 : i32, i32, i32
  }
}

</mosaic_0001>

<bundles_post_ra>
// kernel: tpu_custom_call.1
= control target key start
LH: loop header
LB: loop body
LE: loop exit
PB: predicated region body
PF: predicated region fallthrough
CT: control target
= control target key end

     0   :  { %8 = vsyncpa [#allocation3], 0  ;;  %s1102_s0 = inlined_call_operand.hbm [shape: f32[2,16,16,32], index: 0, kind: input, shape index: {}]   ;;  %s1103_s1 = inlined_call_operand.hbm [shape: f32[2,1,32], index: 1, kind: output, shape index: {0}]   ;;  %s1104_s2 = inlined_call_operand.hbm [shape: f32[2,1,32], index: 2, kind: output, shape index: {1}]  }
   0x1   :  { %10 = vsyncpa [#allocation3 + $0x1], 0 }
   0x2   :  { %11 = vsyncpa [#allocation4], 0 }
   0x3   :  { %13 = vsyncpa [#allocation4 + $0x1], 0 }
   0x4   :  { %14 = vsyncpa [#allocation7], 0 }
   0x5   :  { %16 = vsyncpa [#allocation7 + $0x1], 0  ;;  %s782_s9 = smov 0   ;;  %s784_s10 = smov 0  }
   0x6   :  { %s786_s11 = smov 0   ;;  %s788_s12 = smov 0  }
   0x7   :  { %s790_s13 = smov 0   ;;  %s792_s14 = smov 0  }
   0x8   :  { %s794_s15 = smov 0   ;;  %s796_s16 = smov 0  }
   0x9   :  { %s798_s17 = smov 0   ;;  %s800_s18 = smov 0  }
   0xa   :  { %s802_s19 = smov 0  }
   0xb LB: > { %s448_s20 = sadd.s32 4294967295, %s759_s19   ;;  %s449_s21 = sadd.s32 4294967294, %s759_s19   ;;  %s759_s19 = sphi %s802_s19, %s22_s19   ;;  %s755_s18 = sphi %s800_s18, %s1128_s18   ;;  %s751_s17 = sphi %s798_s17, %s1127_s17   ;;  %s747_s16 = sphi %s796_s16, %s1126_s16   ;;  %s743_s15 = sphi %s794_s15, %s1125_s15   ;;  %s739_s14 = sphi %s792_s14, %s1124_s14   ;;  %s735_s13 = sphi %s790_s13, %s1123_s13   ;;  %s731_s12 = sphi %s788_s12, %s1122_s12   ;;  %s727_s11 = sphi %s786_s11, %s1121_s11   ;;  %s723_s10 = sphi %s784_s10, %s1120_s10   ;;  %s719_s9 = sphi %s782_s9, %s1119_s9  }
   0xc   : > { %s31_s22 = sadd.s32 1, %s751_s17  ;;  %s34_s23 = sadd.s32 1, %s755_s18 }
   0xd   : > { %p32_p0 = scmp.ge.s32.totalorder %s31_s22, 2  ;;  %s43_s24 = sadd.s32 1, %s739_s14 }
   0xe   : > { %p50_p1 = scmp.ne.s32.totalorder %s739_s14, %s735_s13  ;;  %p51_p2 = scmp.eq.s32.totalorder %s759_s19, 0 }
   0xf   : > { %s1130_s22 = smov (%p32_p0, %s31_s22), 0  ;;  %s1132_s23 = smov (!%p32_p0, %s34_s23), %s755_s18 }
  0x10   : > { %1108 = sst [smem:[#allocation11_spill]] %s1130_s22  ;;  %s39_s25 = ssub.s32 %s751_s17, %s1130_s22 }
  0x11   : > { %p848_p3 = por %p51_p2, %p50_p1  ;;  %p36_p4 = scmp.ge.s32.totalorder %s1132_s23, 2 }
  0x12   : > { %p56_p5 = scmp.ne.s32.totalorder %s735_s13, %s731_s12  ;;  %p57_p6 = scmp.eq.s32.totalorder %s448_s20, 0 }
  0x13   : > { %s69_s27 = sadd.s32 1, %s727_s11  ;;  %s1134_s23 = smov (%p36_p4, %s1132_s23), 0 }
  0x14   : > { %1110 = sst [smem:[#allocation12_spill]] %s1134_s23  ;;  %p856_p7 = por %p57_p6, %p56_p5 }
  0x15   : > { %p79_p8 = scmp.ne.s32.totalorder %s727_s11, %s723_s10  ;;  %s38_s29 = ssub.s32 %s755_s18, %s1134_s23 }
  0x16   : > { %p80_p9 = scmp.eq.s32.totalorder %s448_s20, 3  ;;  %s40_s30 = sor.u32 %s39_s25, %s38_s29 }
  0x17   : > { %p67_p10 = scmp.eq.s32.totalorder %s38_s29, 0  ;;  %p41_p11 = scmp.eq.s32.totalorder %s40_s30, 0 }
  0x18   : > { %p864_p12 = por %p80_p9, %p79_p8  ;;  %p85_p13 = scmp.ne.s32.totalorder %s723_s10, %s719_s9 }
  0x19   : > { %s869_s4 = scalar_select %p67_p10, %s727_s11, %s69_s27  }
  0x1a   : > { %s1112_s3 = scalar_select %p864_p12, 1, 0 }
  0x1b   : > { %s872_s5 = scalar_select %p41_p11, %s739_s14, %s43_s24  }
  0x1c   : > { %p86_p0 = scmp.eq.s32.totalorder %s449_s21, 3  ;;  %p482_p1 = scmp.lt.s32.totalorder %s759_s19, 4 }
  0x1d   : > { %s132_s7 = sand.u32 1, %s739_s14   ;;  %s464_s12 = sshll.u32 %s751_s17, 4 }
  0x1e   : > { %p877_p2 = por %p86_p0, %p85_p13  ;;  %s452_s8 = sshll.u32 %s132_s7, 7 }
  0x1f   : > { %s455_s20 = sshll.u32 %s755_s18, 5  ;;  %s136_s25 = scalar_lea.vmem [#allocation2], %s452_s8 }
  0x20   : > { %s1113_s6 = scalar_select %p877_p2, 1, 0 }
  0x21   : > { %s146_s29 = sshll.u32 %s136_s25, 4  ;;  %s143_s30 = sadd.s32 %s464_s12, %s455_s20  ;;  %s884_s29 = int_to_ptr.vmem [resolvable:$true] %s146_s29 }
  0x22   : > { %s456_s27 = sshll.u32 %s143_s30, 7  ;;  %p888_p4 = pnand %p482_p1, %p848_p3 }
  0x23   : > { %s895_s22 = scalar_lea.hbm %s1102_s0, %s456_s27  ;;  %s897_s8 = scalar_lea.sflag [#allocation3], %s132_s7 }
  0x24   : > { %s575_s12 = scalar_lea.hbm %s895_s22, 2048  ;;  %p577_p3 = pneg %p888_p4 }
  0x25   : > { %p576_p5 = scmp.ne.s32.totalorder %s895_s22, %s575_s12  ;;  %s580_s20 = scalar_lea.hbm %s1102_s0, 8192 }
  0x26   : > { %p581_p9 = scmp.lt.u32.totalorder %s895_s22, %s1102_s0  ;;  %p582_p10 = scmp.lt.u32.totalorder %s580_s20, %s575_s12 }
  0x27   : > { %p578_p6 = pnand %p577_p3, %p576_p5  ;;  %p584_p13 = scmp.lt.u32.totalorder %s575_s12, %s895_s22 }
  0x28   : > { %p583_p11 = por %p582_p10, %p581_p9 }
  0x29   : > { %p579_p8 = pneg %p578_p6 }
  0x2a   : > { %p585_p0 = por %p584_p13, %p583_p11 }
  0x2c   : > { %p586_p1 = pnand %p585_p0, %p579_p8 }
  0x2e   : > { %589 = shalt.err (!%p586_p1)
}
  0x2f   : > { %s590_s7 = scalar_lea.vmem %s884_s29, 2048  ;;  %s761_s27 = smov [#allocation2]  }
  0x30   : > { %p591_p5 = scmp.ne.s32.totalorder %s884_s29, %s590_s7  ;;  %s595_s21 = sshll.u32 %s761_s27, 4  ;;  %s596_s21 = int_to_ptr.vmem [resolvable:$false] %s595_s21 }
  0x31   : > { %s597_s26 = scalar_lea.vmem %s596_s21, 4096  ;;  %p598_p12 = scmp.lt.s32.totalorder %s884_s29, %s596_s21 }
  0x32   : > { %p593_p6 = pnand %p591_p5, %p577_p3  ;;  %p599_p9 = scmp.lt.s32.totalorder %s597_s26, %s590_s7 }
  0x34   : > { %p594_p2 = pneg %p593_p6  ;;  %p600_p10 = por %p599_p9, %p598_p12 }
  0x36   : > { %p601_p11 = pnand %p600_p10, %p594_p2 }
  0x38   : > { %604 = shalt.err (!%p601_p11)
}
  0x39   : > { %s762_s12 = smov 128   ;;  %s763_s23 = smov 8  }
  0x3a   : > { %474 = dma.hbm_to_vmem [thread:$0]  (!%p888_p4), %s895_s22, 2048, %s884_s29, %s897_s8, %s762_s12, %s762_s12, %s763_s23  }
  0x3b   : > { %p457_p3 = scmp.ge.s32.totalorder %s759_s19, 1  ;;  %p154_p8 = scmp.lt.s32.totalorder %s759_s19, 5 }
  0x3d   : > { %p155_p13 = pnand %p457_p3, %p154_p8 }
  0x3e   : > { %s160_s20 = sand.u32 (!%p155_p13), 1, %s735_s13  }
  0x3f   : > { %158 = sbr.rel (%p155_p13) target bundleno = 164 (0xa4), region = 24  ;;  %s458_s25 = sshll.u32 (!%p155_p13), %s160_s20, 7 }
  0x40   : > { %s161_s30 = scalar_lea.sflag (!%p155_p13), [#allocation3], %s160_s20  ;;  %s928_s7 = scalar_lea.vmem (!%p155_p13), [#allocation2], %s458_s25 }
  0x46   : > { %706 = dma.done.wait (%p856_p7), %s161_s30, 2048  }
  0x47   : > { %708 = vsyncadd (%p856_p7), %s161_s30, 4294965248  ;;  %s935_s27 = sand.u32 1, %s723_s10   ;;  %p459_p12 = scmp.ne.s32.totalorder %s743_s15, 0 }
  0x48   : > { %s938_s22 = scalar_lea.vmem [#allocation5], %s935_s27  ;;  %s941_s29 = scalar_lea.vmem [#allocation6], %s935_s27  ;;  %vm193_vm0 = vcmask (!%p459_p12), 253952   ;;  %v764_v0 = vmov (!%p459_p12), 0.0  }
  0x49   : > { %192 = sbr.rel (%p459_p12) target bundleno = 80 (0x50), region = 32  ;;  %194 = vst.msk [vmem:[%s938_s22] sm:$0x1] (!%p459_p12), %vm193_vm0, %v764_v0  ;;  %195 = vst.msk [vmem:[%s941_s29] sm:$0x1] (!%p459_p12), %vm193_vm0, %v764_v0 }
  0x50 PF: > { %v196_v1 = vld [vmem:[%s928_s7] sm:$0xff]  ;;  %v197_v2 = vld [vmem:[%s928_s7 + $0x8] sm:$0xff]  ;;  %v198_v3 = vld [vmem:[%s928_s7 + $0x10] sm:$0xff]  ;;  %vm213_vm1 = vcmask 261120   ;;  %s460_s15 = sshll.u32 %s747_s16, 4  ;;  %s327_s28 = sshll.u32 %s938_s22, 4  ;;  %s1004_s28 = int_to_ptr.vmem [resolvable:$true] %s327_s28 }
  0x51   : > { %v214_v4 = vsel %vm213_vm1, %v196_v1, 0.0  ;;  %v215_v5 = vsel %vm213_vm1, %v197_v2, 0.0  ;;  %v217_v6 = vsel %vm213_vm1, %v198_v3, 0.0  ;;  %v199_v7 = vld [vmem:[%s928_s7 + $0x18] sm:$0xff]  ;;  %v200_v10 = vld [vmem:[%s928_s7 + $0x20] sm:$0xff]  ;;  %v201_v13 = vld [vmem:[%s928_s7 + $0x28] sm:$0xff]  ;;  %v255_v15 = vmul.f32 %v196_v1, %v196_v1  ;;  %s1002_s21 = scalar_lea.hbm %s1103_s1, %s460_s15 }
  0x52   : > { %v216_v8 = vadd.f32 %v215_v5, %v214_v4  ;;  %v219_v9 = vsel %vm213_vm1, %v199_v7, 0.0  ;;  %v221_v12 = vsel %vm213_vm1, %v200_v10, 0.0  ;;  %v256_v16 = vmul.f32 %v197_v2, %v197_v2  ;;  %v202_v19 = vld [vmem:[%s928_s7 + $0x30] sm:$0xff]  ;;  %v203_v24 = vld [vmem:[%s928_s7 + $0x38] sm:$0xff]  ;;  %v204_v31 = vld [vmem:[%s928_s7 + $0x40] sm:$0xff]  ;;  %s311_s26 = scalar_lea.sflag [#allocation4], %s935_s27 }
  0x53   : > { %v257_v17 = vmul.f32 %v198_v3, %v198_v3  ;;  %v223_v18 = vsel %vm213_vm1, %v201_v13, 0.0  ;;  %v258_v21 = vmul.f32 %v199_v7, %v199_v7  ;;  %v225_v22 = vsel %vm213_vm1, %v202_v19, 0.0  ;;  %v205_v37 = vld [vmem:[%s928_s7 + $0x48] sm:$0xff]  ;;  %v206_v43 = vld [vmem:[%s928_s7 + $0x50] sm:$0xff]  ;;  %v207_v49 = vld [vmem:[%s928_s7 + $0x58] sm:$0xff]  ;;  %s605_s12 = scalar_lea.vmem %s1004_s28, 16 }
  0x54   : > { %v218_v11 = vadd.f32 %v217_v6, %v216_v8  ;;  %v259_v23 = vmul.f32 %v200_v10, %v200_v10  ;;  %v271_v26 = vsel %vm213_vm1, %v255_v15, 0.0  ;;  %v272_v27 = vsel %vm213_vm1, %v256_v16, 0.0  ;;  %v208_v55 = vld [vmem:[%s928_s7 + $0x60] sm:$0xff]  ;;  %v209_v61 = vld [vmem:[%s928_s7 + $0x68] sm:$0xff]  ;;  %v210_v3 = vld [vmem:[%s928_s7 + $0x70] sm:$0xff]  ;;  %p606_p7 = scmp.ne.s32.totalorder %s1004_s28, %s605_s12  ;;  %p1115_p2 = scmp.ne.s32.totalorder %s1112_s3, 0 }
  0x55   : > { %v274_v28 = vsel %vm213_vm1, %v257_v17, 0.0  ;;  %v227_v29 = vsel %vm213_vm1, %v203_v24, 0.0  ;;  %v273_v30 = vadd.f32 %v272_v27, %v271_v26  ;;  %v260_v33 = vmul.f32 %v201_v13, %v201_v13  ;;  %s765_s23 = smov [#allocation5]  }
  0x56   : > { %v220_v14 = vadd.f32 %v219_v9, %v218_v11  ;;  %v276_v34 = vsel %vm213_vm1, %v258_v21, 0.0  ;;  %v229_v35 = vsel %vm213_vm1, %v204_v31, 0.0  ;;  %v261_v39 = vmul.f32 %v202_v19, %v202_v19  ;;  %v211_v9 = vld [vmem:[%s928_s7 + $0x78] sm:$0xff]  ;;  %p607_p4 = pnand %p606_p7, %p1115_p2  ;;  %s609_s20 = sshll.u32 %s765_s23, 4  ;;  %s610_s20 = int_to_ptr.vmem [resolvable:$false] %s609_s20 }
  0x57   : > { %v275_v36 = vadd.f32 %v274_v28, %v273_v30  ;;  %v278_v40 = vsel %vm213_vm1, %v259_v23, 0.0  ;;  %v231_v41 = vsel %vm213_vm1, %v205_v37, 0.0  ;;  %v262_v45 = vmul.f32 %v203_v24, %v203_v24  ;;  %s611_s25 = scalar_lea.vmem %s610_s20, 32  ;;  %p612_p1 = scmp.lt.s32.totalorder %s1004_s28, %s610_s20 }
  0x58   : > { %v222_v20 = vadd.f32 %v221_v12, %v220_v14  ;;  %v280_v46 = vsel %vm213_vm1, %v260_v33, 0.0  ;;  %v233_v47 = vsel %vm213_vm1, %v206_v43, 0.0  ;;  %v263_v51 = vmul.f32 %v204_v31, %v204_v31  ;;  %p608_p0 = pneg %p607_p4  ;;  %p613_p5 = scmp.lt.s32.totalorder %s611_s25, %s605_s12 }
  0x59   : > { %v277_v42 = vadd.f32 %v276_v34, %v275_v36  ;;  %v282_v52 = vsel %vm213_vm1, %v261_v39, 0.0  ;;  %v235_v53 = vsel %vm213_vm1, %v207_v49, 0.0  ;;  %v264_v57 = vmul.f32 %v205_v37, %v205_v37  ;;  %v212_v36 = vld [vmem:[%s938_s22] sm:$0x1] }
  0x5a   : > { %v224_v25 = vadd.f32 %v223_v18, %v222_v20  ;;  %v284_v58 = vsel %vm213_vm1, %v262_v45, 0.0  ;;  %v237_v59 = vsel %vm213_vm1, %v208_v55, 0.0  ;;  %v265_v63 = vmul.f32 %v206_v43, %v206_v43  ;;  %p614_p6 = por %p613_p5, %p612_p1 }
  0x5b   : > { %v279_v48 = vadd.f32 %v278_v40, %v277_v42  ;;  %v286_v0 = vsel %vm213_vm1, %v263_v51, 0.0  ;;  %v239_v1 = vsel %vm213_vm1, %v209_v61, 0.0  ;;  %v266_v5 = vmul.f32 %v207_v49, %v207_v49 }
  0x5c   : > { %v226_v32 = vadd.f32 %v225_v22, %v224_v25  ;;  %v288_v6 = vsel %vm213_vm1, %v264_v57, 0.0  ;;  %v241_v7 = vsel %vm213_vm1, %v210_v3, 0.0  ;;  %v267_v11 = vmul.f32 %v208_v55, %v208_v55  ;;  %p615_p9 = pnand %p614_p6, %p608_p0 }
  0x5d   : > { %v281_v54 = vadd.f32 %v280_v46, %v279_v48  ;;  %v290_v12 = vsel %vm213_vm1, %v265_v63, 0.0  ;;  %v243_v13 = vsel %vm213_vm1, %v211_v9, 0.0  ;;  %v268_v16 = vmul.f32 %v209_v61, %v209_v61 }
  0x5e   : > { %v228_v38 = vadd.f32 %v227_v29, %v226_v32  ;;  %v292_v17 = vsel %vm213_vm1, %v266_v5, 0.0  ;;  %v269_v20 = vmul.f32 %v210_v3, %v210_v3  ;;  %v294_v21 = vsel %vm213_vm1, %v267_v11, 0.0 }
  0x5f   : > { %v283_v60 = vadd.f32 %v282_v52, %v281_v54  ;;  %v270_v24 = vmul.f32 %v211_v9, %v211_v9  ;;  %v296_v25 = vsel %vm213_vm1, %v268_v16, 0.0  ;;  %vm252_vm2 = vcmask 253952  }
  0x60   : > { %v230_v44 = vadd.f32 %v229_v35, %v228_v38  ;;  %v298_v28 = vsel %vm213_vm1, %v269_v20, 0.0 }
  0x61   : > { %v285_v2 = vadd.f32 %v284_v58, %v283_v60  ;;  %v300_v31 = vsel %vm213_vm1, %v270_v24, 0.0 }
  0x62   : > { %v232_v50 = vadd.f32 %v231_v41, %v230_v44 }
  0x63   : > { %v287_v8 = vadd.f32 %v286_v0, %v285_v2 }
  0x64   : > { %v234_v56 = vadd.f32 %v233_v47, %v232_v50 }
  0x65   : > { %v289_v14 = vadd.f32 %v288_v6, %v287_v8 }
  0x66   : > { %v236_v62 = vadd.f32 %v235_v53, %v234_v56 }
  0x67   : > { %v291_v18 = vadd.f32 %v290_v12, %v289_v14 }
  0x68   : > { %v238_v4 = vadd.f32 %v237_v59, %v236_v62 }
  0x69   : > { %v293_v22 = vadd.f32 %v292_v17, %v291_v18 }
  0x6a   : > { %v240_v10 = vadd.f32 %v239_v1, %v238_v4 }
  0x6b   : > { %v295_v26 = vadd.f32 %v294_v21, %v293_v22 }
  0x6c   : > { %v242_v15 = vadd.f32 %v241_v7, %v240_v10 }
  0x6d   : > { %v297_v29 = vadd.f32 %v296_v25, %v295_v26 }
  0x6e   : > { %v244_v19 = vadd.f32 %v243_v13, %v242_v15 }
  0x6f   : > { %v299_v32 = vadd.f32 %v298_v28, %v297_v29 }
  0x70   : > { %v245_v23 = vrot.slane %v244_v19, 4 }
  0x71   : > { %v301_v34 = vadd.f32 %v300_v31, %v299_v32 }
  0x72   : > { %v246_v27 = vadd.f32 %v245_v23, %v244_v19 }
  0x73   : > { %v302_v37 = vrot.slane %v301_v34, 4 }
  0x74   : > { %v247_v30 = vrot.slane %v246_v27, 2 }
  0x75   : > { %v303_v39 = vadd.f32 %v302_v37, %v301_v34 }
  0x76   : > { %v248_v33 = vadd.f32 %v247_v30, %v246_v27 }
  0x77   : > { %v304_v41 = vrot.slane %v303_v39, 2 }
  0x78   : > { %v249_v35 = vrot.slane %v248_v33, 1 }
  0x79   : > { %v305_v42 = vadd.f32 %v304_v41, %v303_v39 }
  0x7a   : > { %v250_v38 = vadd.f32 %v249_v35, %v248_v33 }
  0x7c   : > { %v251_v40 = vadd.f32 %v250_v38, %v212_v36 }
  0x7e   : > { %253 = vst.msk [vmem:[%s938_s22] sm:$0x1] %vm252_vm2, %v251_v40 }
  0x7f   : > { %618 = shalt.err (!%p615_p9)
}
  0x80   : > { %s619_s30 = scalar_lea.hbm %s1002_s21, 16  ;;  %s623_s24 = scalar_lea.hbm %s1103_s1, 32 }
  0x81   : > { %p620_p10 = scmp.ne.s32.totalorder %s1002_s21, %s619_s30  ;;  %p624_p8 = scmp.lt.u32.totalorder %s1002_s21, %s1103_s1 }
  0x82   : > { %p625_p13 = scmp.lt.u32.totalorder %s623_s24, %s619_s30  ;;  %p627_p7 = scmp.lt.u32.totalorder %s619_s30, %s1002_s21 }
  0x83   : > { %p621_p11 = pnand %p620_p10, %p1115_p2 }
  0x84   : > { %p626_p12 = por %p625_p13, %p624_p8 }
  0x85   : > { %p622_p3 = pneg %p621_p11 }
  0x86   : > { %p628_p4 = por %p627_p7, %p626_p12 }
  0x88   : > { %p629_p0 = pnand %p628_p4, %p622_p3 }
  0x8a   : > { %632 = shalt.err (!%p629_p0)
}
  0x8b   : > { %467 = dma.vmem_to_hbm [thread:$0]  (%p1115_p2), %s1004_s28, 16, %s1002_s21, %s311_s26   ;;  %v306_v43 = vrot.slane %v305_v42, 1  ;;  %v254_v44 = vld [vmem:[%s941_s29] sm:$0x1] }
  0x8c   : > { %s340_s12 = sshll.u32 %s941_s29, 4  ;;  %s1037_s30 = scalar_lea.hbm %s1104_s2, %s460_s15  ;;  %s1039_s12 = int_to_ptr.vmem [resolvable:$true] %s340_s12 }
  0x8d   : > { %v307_v45 = vadd.f32 %v306_v43, %v305_v42  ;;  %s315_s7 = scalar_lea.sflag [#allocation7], %s935_s27  ;;  %s633_s28 = scalar_lea.vmem %s1039_s12, 16 }
  0x8e   : > { %p634_p1 = scmp.ne.s32.totalorder %s1039_s12, %s633_s28  ;;  %s766_s21 = smov [#allocation6]  }
  0x8f   : > { %v308_v46 = vadd.f32 %v307_v45, %v254_v44  ;;  %s637_s16 = sshll.u32 %s766_s21, 4  ;;  %s638_s16 = int_to_ptr.vmem [resolvable:$false] %s637_s16 }
  0x90   : > { %p635_p5 = pnand %p634_p1, %p1115_p2  ;;  %s639_s26 = scalar_lea.vmem %s638_s16, 32 }
  0x91   : > { %309 = vst.msk [vmem:[%s941_s29] sm:$0x1] %vm252_vm2, %v308_v46  ;;  %p640_p9 = scmp.lt.s32.totalorder %s1039_s12, %s638_s16  ;;  %p641_p10 = scmp.lt.s32.totalorder %s639_s26, %s633_s28 }
  0x92   : > { %p636_p6 = pneg %p635_p5 }
  0x93   : > { %p642_p11 = por %p641_p10, %p640_p9 }
  0x95   : > { %p643_p3 = pnand %p642_p11, %p636_p6 }
  0x97   : > { %646 = shalt.err (!%p643_p3)
}
  0x98   : > { %s647_s27 = scalar_lea.hbm %s1037_s30, 16  ;;  %s651_s22 = scalar_lea.hbm %s1104_s2, 32 }
  0x99   : > { %p648_p8 = scmp.ne.s32.totalorder %s1037_s30, %s647_s27  ;;  %p652_p7 = scmp.lt.u32.totalorder %s1037_s30, %s1104_s2 }
  0x9a   : > { %p653_p4 = scmp.lt.u32.totalorder %s651_s22, %s647_s27  ;;  %p655_p1 = scmp.lt.u32.totalorder %s647_s27, %s1037_s30 }
  0x9b   : > { %p649_p13 = pnand %p648_p8, %p1115_p2 }
  0x9c   : > { %p654_p0 = por %p653_p4, %p652_p7 }
  0x9d   : > { %p650_p12 = pneg %p649_p13 }
  0x9e   : > { %p656_p5 = por %p655_p1, %p654_p0 }
  0xa0   : > { %p657_p6 = pnand %p656_p5, %p650_p12 }
  0xa2   : > { %660 = shalt.err (!%p657_p6)
}
  0xa3   : > { %468 = dma.vmem_to_hbm [thread:$0]  (%p1115_p2), %s1039_s12, 16, %s1037_s30, %s315_s7  }
  0xa4 PF: > { %p483_p9 = scmp.ge.s32.totalorder %s759_s19, 2  ;;  %s352_s23 = sand.u32 1, %s719_s9  }
  0xa5   : > { %p1116_p10 = scmp.ne.s32.totalorder %s1113_s6, 0  ;;  %s353_s20 = scalar_lea.sflag [#allocation4], %s352_s23 }
  0xa7   : > { %p476_p11 = pnand %p483_p9, %p1116_p10 }
  0xa9   : > { %710 = dma.done.wait (!%p476_p11), %s353_s20, 16  }
  0xaa   : > { %712 = vsyncadd (!%p476_p11), %s353_s20, 4294967280  ;;  %s361_s25 = scalar_lea.sflag [#allocation7], %s352_s23 }
  0xab   : > { %714 = dma.done.wait (!%p476_p11), %s361_s25, 16  }
  0xac   : > { %716 = vsyncadd (!%p476_p11), %s361_s25, 4294967280  ;;  %s22_s19 = sadd.s32 1, %s759_s19   ;;  %s1117_s3 = sld [smem:[#allocation11_spill]] }
  0xad   : > { %p19_p3 = scmp.ge.s32.totalorder %s22_s19, 6   ;;  %s1118_s6 = sld [smem:[#allocation12_spill]] }
  0xae   : > { %s1119_s9 = smov %s723_s10  ;;  %s1120_s10 = smov %s727_s11 }
  0xaf   : > { %s1121_s11 = smov %s869_s4  ;;  %s1122_s12 = smov %s735_s13 }
  0xb0   : > { %s1123_s13 = smov %s739_s14  ;;  %s1124_s14 = smov %s872_s5 }
  0xb1   : > { %s1125_s15 = smov %s751_s17  ;;  %s1126_s16 = smov %s755_s18 }
  0xb2   : > { %s1127_s17 = smov %s1117_s3  ;;  %21 = sbr.rel (!%p19_p3) target bundleno = 11 (0xb), region = 90 }
  0xb3   : > { %s1128_s18 = smov %s1118_s6 }
  0xb9   :  { %365 = vsyncpa [#allocation3], 1 }
  0xba   :  { %367 = vsyncpa [#allocation3 + $0x1], 1 }
  0xbb   :  { %368 = vsyncpa [#allocation4], 1 }
  0xbc   :  { %370 = vsyncpa [#allocation4 + $0x1], 1 }
  0xbd   :  { %371 = vsyncpa [#allocation7], 1 }
  0xbe   :  { %373 = vsyncpa [#allocation7 + $0x1], 1 }

</bundles_post_ra>
